<compile_context>
chip_gen: v6e
topology: v6e:2x2x1
jax: 0.10.0
libtpu: 0.0.40
codegen_flags: <defaults>
</compile_context>

<pallas_src>
import functools

import jax
import jax.numpy as jnp
from jax.experimental import pallas as pl
from jax.experimental.pallas import tpu as pltpu


# ----------------------------------------------------------------------------
# Pallas kernel: per-chunk input-gate GEMM + masked (packed) GRU recurrence.
# grid = (batch_tiles ["parallel"], time_chunks ["arbitrary"]).
# ----------------------------------------------------------------------------
def _gru_decoder_kernel(x_ref, h0_ref, wc_ref, bc_ref, whh_ref, bhn_ref,
                        lens_ref, out_ref, state_ref, gi_scr, h_scr):
    TC, B, D = x_ref.shape          # time-chunk, batch-tile, padded input dim
    H = state_ref.shape[-1]         # padded hidden dim
    t_idx = pl.program_id(1)        # time-chunk index (innermost, "arbitrary")

    # Initialize the cross-chunk hidden carry from h0 on the first time chunk.
    @pl.when(t_idx == 0)
    def _():
        h_scr[...] = h0_ref[...]

    # --- Per-chunk prologue: input gates for this chunk's TC timesteps in ONE
    # lane-dense MXU GEMM (bf16/f32 operands, f32 accumulate), written straight
    # into a 2-D VMEM scratch.  (mixture Linear, b_ih, b_hr, b_hz already
    # folded into wc/bc by prepare_params.)
    mxu_dt = whh_ref.dtype
    # (TC, 8k, D) -> (TC*8k, D): sublane tiles stay intact (B is a multiple of 8).
    x2d = x_ref[...].reshape(TC * B, D).astype(mxu_dt)
    gi_scr[...] = (jnp.dot(x2d, wc_ref[...], preferred_element_type=jnp.float32)
                   + bc_ref[...])

    whh = whh_ref[...]              # (H, 3H) recurrent weights, resident
    bhn = bhn_ref[...]              # (1, H)  b_hn only (must stay inside r*(...))
    lens = lens_ref[...]            # (B, H)  int32 lengths, lane-broadcast
    chunk_start = t_idx * TC

    def step(t, h):
        gi = gi_scr[pl.ds(t * B, B), :]                               # (B, 3H)
        gh = jnp.dot(h.astype(mxu_dt), whh,
                     preferred_element_type=jnp.float32)              # (B, 3H)
        r = jax.nn.sigmoid(gi[:, :H] + gh[:, :H])
        z = jax.nn.sigmoid(gi[:, H:2 * H] + gh[:, H:2 * H])
        n = jnp.tanh(gi[:, 2 * H:] + r * (gh[:, 2 * H:] + bhn))
        h_new = (1.0 - z) * n + z * h
        # Validity mask at full lane width (no (B,1)->(B,H) relayout per step).
        mask = lens > (chunk_start + t)
        out_ref[t] = jnp.where(mask, h_new, 0.0)    # packed-seq zero padding (side store)
        return jnp.where(mask, h_new, h)            # single vselect on the serial carry

    # TC is small & static -> full unroll keeps LLO overlap without vreg spills.
    # TODO(synk): for production-sized time chunks use unroll=2..4 instead.
    h_final = jax.lax.fori_loop(0, TC, step, h_scr[...], unroll=True)
    h_scr[...] = h_final                           # carry to the next chunk

    @pl.when(t_idx == pl.num_programs(1) - 1)
    def _():
        state_ref[...] = h_final                   # final state, written once


def _run_gru_kernel(x_tm, lens_bc, h0, w_comb, b_comb, whh_t, bhn, *,
                    t_chunk, b_tile):
    T_pad, B_pad, D_pad = x_tm.shape
    H_pad = h0.shape[-1]
    G_pad = 3 * H_pad
    nb = B_pad // b_tile
    nt = T_pad // t_chunk

    out_tm, h_final = pl.pallas_call(
        _gru_decoder_kernel,
        out_shape=[
            jax.ShapeDtypeStruct((T_pad, B_pad, H_pad), jnp.float32),
            jax.ShapeDtypeStruct((B_pad, H_pad), jnp.float32),
        ],
        grid=(nb, nt),
        in_specs=[
            # Streamed per-chunk input (default double-buffered -> DMA overlap).
            pl.BlockSpec((t_chunk, b_tile, D_pad), lambda b, t: (t, b, 0)),
            pl.BlockSpec((b_tile, H_pad), lambda b, t: (b, 0)),   # h0
            pl.BlockSpec((D_pad, G_pad), lambda b, t: (0, 0)),    # (mixture ∘ W_ih)^T (mxu dtype)
            pl.BlockSpec((1, G_pad), lambda b, t: (0, 0)),        # folded input bias (+ b_hr, b_hz)
            pl.BlockSpec((H_pad, G_pad), lambda b, t: (0, 0)),    # W_hh^T (mxu dtype)
            pl.BlockSpec((1, H_pad), lambda b, t: (0, 0)),        # b_hn
            pl.BlockSpec((b_tile, H_pad), lambda b, t: (b, 0)),   # lengths, lane-broadcast i32
        ],
        out_specs=[
            # Streamed per-chunk output (lane-dense stores).
            pl.BlockSpec((t_chunk, b_tile, H_pad), lambda b, t: (t, b, 0)),
            # Final state: same block across the time axis -> written at last chunk.
            pl.BlockSpec((b_tile, H_pad), lambda b, t: (b, 0)),
        ],
        scratch_shapes=[
            pltpu.VMEM((t_chunk * b_tile, G_pad), jnp.float32),   # staged input gates
            pltpu.VMEM((b_tile, H_pad), jnp.float32),             # hidden carry (f32)
        ],
        compiler_params=pltpu.CompilerParams(
            dimension_semantics=("parallel", "arbitrary"),
            vmem_limit_bytes=64 * 1024 * 1024,
        ),
    )(x_tm, h0, w_comb, b_comb, whh_t, bhn, lens_bc)
    return out_tm, h_final


# ----------------------------------------------------------------------------
# One-time parameter preprocessing (hoisted out of the jitted forward).
# ----------------------------------------------------------------------------
def _round_up(x, m):
    return ((x + m - 1) // m) * m


def _pad_dim(a, axis, new_size):
    if a.shape[axis] == new_size:
        return a
    pad = [(0, 0)] * a.ndim
    pad[axis] = (0, new_size - a.shape[axis])
    return jnp.pad(a, pad)


def _pad_gates(a, h, h_pad):
    # Last axis is 3H laid out as [r | z | n]; zero-pad each gate block to h_pad.
    if h_pad == h:
        return a
    lead = a.shape[:-1]
    g = a.reshape(lead + (3, h))
    g = _pad_dim(g, g.ndim - 1, h_pad)
    return g.reshape(lead + (3 * h_pad,))


def prepare_params(params, mxu_dtype=jnp.bfloat16):
    """Fold mixture Linear + b_ih + (b_hr, b_hz) into one input projection,
    pad to (8,128)-friendly tiles, and cast MXU operands.  Run ONCE."""
    w_mix = params["w_mix"].astype(jnp.float32)   # (H, H)
    b_mix = params["b_mix"].astype(jnp.float32)   # (H,)
    w_ih = params["w_ih"].astype(jnp.float32)     # (3H, D), D == H
    b_ih = params["b_ih"].astype(jnp.float32)     # (3H,)
    w_hh = params["w_hh"].astype(jnp.float32)     # (3H, H)
    b_hh = params["b_hh"].astype(jnp.float32)     # (3H,)

    H = w_hh.shape[1]
    D = w_ih.shape[1]

    # gi = (x @ Wm^T + bm) @ Wih^T + bih = x @ (Wih @ Wm)^T + (bm @ Wih^T + bih)
    w_comb = (w_ih @ w_mix).T                     # (D, 3H)
    b_comb = b_mix @ w_ih.T + b_ih                # (3H,)
    # b_hr / b_hz sit outside the r* term in the GRU -> fold them into b_comb;
    # b_hn must stay inside r*(h @ W_hn + b_hn).
    b_comb = b_comb + jnp.concatenate([b_hh[:2 * H], jnp.zeros((H,), jnp.float32)])
    b_hn = b_hh[2 * H:]

    H_pad = _round_up(H, 128)
    D_pad = _round_up(D, 128)
    G_pad = 3 * H_pad

    return {
        "w_comb": _pad_dim(_pad_gates(w_comb, H, H_pad), 0, D_pad).astype(mxu_dtype),
        "b_comb": _pad_gates(b_comb, H, H_pad).reshape(1, G_pad),
        "w_hh_t": _pad_dim(_pad_gates(w_hh.T, H, H_pad), 0, H_pad).astype(mxu_dtype),
        "b_hn":   _pad_dim(b_hn, 0, H_pad).reshape(1, H_pad),
    }


# ----------------------------------------------------------------------------
# Wrapper reproducing DynamicDecoder.forward (use_attention=False, 1 layer,
# unidirectional). Sort / unsort / pad glue stays in JAX.
# ----------------------------------------------------------------------------
@functools.partial(jax.jit, static_argnames=("hidden_dim", "t_chunk"))
def dynamic_decoder_forward(input_sequences, input_lengths, state, prepped, *,
                            hidden_dim, t_chunk=8):
    B, T, D = input_sequences.shape
    H = hidden_dim
    D_pad, G_pad = prepped["w_comb"].shape
    H_pad = G_pad // 3

    # Sort batch by descending length (pack_padded_sequence requirement).
    sorted_indices = jnp.argsort(-input_lengths)
    original_idx = jnp.argsort(sorted_indices)
    x_sorted = jnp.take(input_sequences, sorted_indices, axis=0).astype(jnp.float32)
    lens_sorted = jnp.take(input_lengths, sorted_indices, axis=0).astype(jnp.int32)

    # NOTE: the PyTorch reference does NOT reorder `state` when sorting, and
    # returns the final state in "as-run" (sorted) order -- reproduced.
    h0 = state[0].astype(jnp.float32)                                 # (B, H)

    # Batch tiling: sublane multiple of 8; the leading grid axis is "parallel"
    # so on v7x the two TensorCores can split batch tiles.
    if B <= 128:
        B_pad = _round_up(B, 8)
        b_tile = B_pad
    else:
        b_tile = 128
        B_pad = _round_up(B, b_tile)
    T_pad = _round_up(T, t_chunk)

    x_tm = jnp.transpose(x_sorted, (1, 0, 2))                         # (T, B, D)
    x_tm = _pad_dim(_pad_dim(_pad_dim(x_tm, 0, T_pad), 1, B_pad), 2, D_pad)
    h0_p = _pad_dim(_pad_dim(h0, 0, B_pad), 1, H_pad)                 # (B_pad, H_pad)

    lens_p = _pad_dim(lens_sorted, 0, B_pad)                          # padded rows len=0
    # Pre-broadcast lengths across lanes so the in-kernel mask is full-width.
    lens_bc = jnp.broadcast_to(lens_p[:, None], (B_pad, H_pad)).astype(jnp.int32)

    out_tm, h_final = _run_gru_kernel(
        x_tm, lens_bc, h0_p, prepped["w_comb"], prepped["b_comb"],
        prepped["w_hh_t"], prepped["b_hn"], t_chunk=t_chunk, b_tile=b_tile)

    output = jnp.transpose(out_tm[:T, :B, :H], (1, 0, 2))             # (B, T, H)
    output = jnp.take(output, original_idx, axis=0)                   # original order
    # Output already has max_num_steps = T timesteps (zeros past each length),
    # matching pad_packed_sequence + F.pad in the reference.
    new_state = h_final[:B, :H][None]                                 # (1, B, H), sorted order
    return output, new_state


# ----------------------------------------------------------------------------
# Pure-JAX reference (mirrors PyTorch packed-GRU semantics) for verification.
# ----------------------------------------------------------------------------
def reference_forward(x, lengths, state, params):
    B, T, D = x.shape
    H = params["w_hh"].shape[-1]
    u = x @ params["w_mix"].T + params["b_mix"]
    sorted_indices = jnp.argsort(-lengths)
    original_idx = jnp.argsort(sorted_indices)
    u = u[sorted_indices]
    lens = lengths[sorted_indices]
    h = state[0]
    outs = []
    for t in range(T):
        gi = u[:, t, :] @ params["w_ih"].T + params["b_ih"]
        gh = h @ params["w_hh"].T + params["b_hh"]
        r = jax.nn.sigmoid(gi[:, :H] + gh[:, :H])
        z = jax.nn.sigmoid(gi[:, H:2 * H] + gh[:, H:2 * H])
        n = jnp.tanh(gi[:, 2 * H:] + r * gh[:, 2 * H:])
        h_new = (1.0 - z) * n + z * h
        valid = (lens > t)[:, None]
        outs.append(jnp.where(valid, h_new, 0.0))
        h = jnp.where(valid, h_new, h)
    out = jnp.stack(outs, axis=1)[original_idx]
    return out, h[None]


if __name__ == "__main__":
    # hidden_dim == input_dim (required by the mixture Linear), use_attention=False,
    # num_layers=1, is_bidirectional=False.
    B, T, H = 4, 8, 32
    D = H

    key = jax.random.PRNGKey(0)
    ks = jax.random.split(key, 8)
    s = 1.0 / jnp.sqrt(H)
    params = {
        "w_mix": jax.random.uniform(ks[0], (H, H), jnp.float32, -s, s),
        "b_mix": jax.random.uniform(ks[1], (H,), jnp.float32, -s, s),
        "w_ih":  jax.random.uniform(ks[2], (3 * H, D), jnp.float32, -s, s),
        "b_ih":  jax.random.uniform(ks[3], (3 * H,), jnp.float32, -s, s),
        "w_hh":  jax.random.uniform(ks[4], (3 * H, H), jnp.float32, -s, s),
        "b_hh":  jax.random.uniform(ks[5], (3 * H,), jnp.float32, -s, s),
    }

    x = jax.random.normal(ks[6], (B, T, D), jnp.float32)
    lengths = jnp.array([8, 3, 5, 6], dtype=jnp.int32)      # distinct, >= 1
    state = jax.random.normal(ks[7], (1, B, H), jnp.float32)

    ref_out, ref_state = reference_forward(x, lengths, state, params)

    # (a) f32 MXU operands: bit-faithful semantics, tight tolerance.
    #     t_chunk=4 with T=8 exercises the cross-chunk hidden carry.
    prep_f32 = prepare_params(params, mxu_dtype=jnp.float32)
    out32, st32 = dynamic_decoder_forward(x, lengths, state, prep_f32,
                                          hidden_dim=H, t_chunk=4)
    jax.block_until_ready((out32, st32))
    assert out32.shape == (B, T, H) and st32.shape == (1, B, H)
    assert jnp.allclose(out32, ref_out, atol=1e-3, rtol=1e-3)
    assert jnp.allclose(st32, ref_state, atol=1e-3, rtol=1e-3)

    # (b) bf16 MXU operands (f32 accumulate, f32 gate math & carry): fast path,
    #     looser tolerance due to bf16 operand rounding only.
    prep_bf16 = prepare_params(params, mxu_dtype=jnp.bfloat16)
    out16, st16 = dynamic_decoder_forward(x, lengths, state, prep_bf16,
                                          hidden_dim=H, t_chunk=4)
    jax.block_until_ready((out16, st16))
    assert jnp.allclose(out16, ref_out, atol=3e-2, rtol=3e-2)
    assert jnp.allclose(st16, ref_state, atol=3e-2, rtol=3e-2)

    print("KERNEL_OK")
</pallas_src>

<mosaic_0001>
module attributes {stable_mosaic.version = 11 : i64} {
  func.func @_gru_decoder_kernel(%arg0: i32, %arg1: i32, %arg2: memref<4x8x128xf32, #tpu.memory_space<vmem>>, %arg3: memref<8x128xf32, #tpu.memory_space<vmem>>, %arg4: memref<128x384xf32, #tpu.memory_space<vmem>>, %arg5: memref<1x384xf32, #tpu.memory_space<vmem>>, %arg6: memref<128x384xf32, #tpu.memory_space<vmem>>, %arg7: memref<1x128xf32, #tpu.memory_space<vmem>>, %arg8: memref<8x128xi32, #tpu.memory_space<vmem>>, %arg9: memref<4x8x128xf32, #tpu.memory_space<vmem>>, %arg10: memref<8x128xf32, #tpu.memory_space<vmem>>, %arg11: memref<32x384xf32, #tpu.memory_space<vmem>>, %arg12: memref<8x128xf32, #tpu.memory_space<vmem>>) attributes {dimension_semantics = [#tpu.dimension_semantics<parallel>, #tpu.dimension_semantics<arbitrary>], iteration_bounds = array<i64: 1, 2>, scalar_prefetch = 0 : i64, scratch_operands = 2 : i64, tpu.core_type = #tpu.core_type<tc>, window_params = [{transform_indices = @transform_0, window_bounds = array<i64: 4, 8, 128>}, {transform_indices = @transform_1, window_bounds = array<i64: 8, 128>}, {pipeline_mode = #tpu.pipeline_mode<synchronous>, transform_indices = @transform_2, window_bounds = array<i64: 128, 384>}, {pipeline_mode = #tpu.pipeline_mode<synchronous>, transform_indices = @transform_3, window_bounds = array<i64: 1, 384>}, {pipeline_mode = #tpu.pipeline_mode<synchronous>, transform_indices = @transform_4, window_bounds = array<i64: 128, 384>}, {pipeline_mode = #tpu.pipeline_mode<synchronous>, transform_indices = @transform_5, window_bounds = array<i64: 1, 128>}, {transform_indices = @transform_6, window_bounds = array<i64: 8, 128>}, {transform_indices = @transform_7, window_bounds = array<i64: 4, 8, 128>}, {transform_indices = @transform_8, window_bounds = array<i64: 8, 128>}]} {
    %c0_i32 = arith.constant 0 : i32
    %0 = arith.cmpi eq, %arg1, %c0_i32 : i32
    %1 = arith.extui %0 : i1 to i32
    %c0_i32_0 = arith.constant 0 : i32
    %2 = arith.cmpi ne, %1, %c0_i32_0 : i32
    scf.if %2 {
      %c0_58 = arith.constant 0 : index
      %c0_59 = arith.constant 0 : index
      %188 = vector.load %arg3[%c0_58, %c0_59] : memref<8x128xf32, #tpu.memory_space<vmem>>, vector<8x128xf32>
      %c0_60 = arith.constant 0 : index
      %c0_61 = arith.constant 0 : index
      %189 = vector.load %arg12[%c0_60, %c0_61] : memref<8x128xf32, #tpu.memory_space<vmem>>, vector<8x128xf32>
      tpu.vector_store %arg12[%c0_60, %c0_61], %188 {strides = array<i32>} : memref<8x128xf32, #tpu.memory_space<vmem>>, vector<8x128xf32>,
    } else {
    }
    %c0 = arith.constant 0 : index
    %c0_1 = arith.constant 0 : index
    %c0_2 = arith.constant 0 : index
    %3 = vector.load %arg2[%c0, %c0_1, %c0_2] : memref<4x8x128xf32, #tpu.memory_space<vmem>>, vector<4x8x128xf32>
    %4 = vector.shape_cast %3 : vector<4x8x128xf32> to vector<32x128xf32>
    %c0_3 = arith.constant 0 : index
    %c0_4 = arith.constant 0 : index
    %5 = vector.load %arg4[%c0_3, %c0_4] : memref<128x384xf32, #tpu.memory_space<vmem>>, vector<128x384xf32>
    %cst = arith.constant dense<0.000000e+00> : vector<32x384xf32>
    %6 = tpu.matmul %4, %5, %cst {dimension_numbers = #tpu.dot_dimension_numbers<[1], [0], [0], [1], [0, 0, 1, 1], [], []>} : vector<32x128xf32>, vector<128x384xf32>, vector<32x384xf32> -> vector<32x384xf32>
    %c0_5 = arith.constant 0 : index
    %c0_6 = arith.constant 0 : index
    %7 = vector.load %arg5[%c0_5, %c0_6] : memref<1x384xf32, #tpu.memory_space<vmem>>, vector<1x384xf32>
    %8 = vector.broadcast %7 : vector<1x384xf32> to vector<32x384xf32>
    %9 = arith.addf %6, %8 : vector<32x384xf32>
    %c0_7 = arith.constant 0 : index
    %c0_8 = arith.constant 0 : index
    %10 = vector.load %arg11[%c0_7, %c0_8] : memref<32x384xf32, #tpu.memory_space<vmem>>, vector<32x384xf32>
    tpu.vector_store %arg11[%c0_7, %c0_8], %9 {strides = array<i32>} : memref<32x384xf32, #tpu.memory_space<vmem>>, vector<32x384xf32>,
    %c0_9 = arith.constant 0 : index
    %c0_10 = arith.constant 0 : index
    %11 = vector.load %arg6[%c0_9, %c0_10] : memref<128x384xf32, #tpu.memory_space<vmem>>, vector<128x384xf32>
    %c0_11 = arith.constant 0 : index
    %c0_12 = arith.constant 0 : index
    %12 = vector.load %arg7[%c0_11, %c0_12] : memref<1x128xf32, #tpu.memory_space<vmem>>, vector<1x128xf32>
    %c0_13 = arith.constant 0 : index
    %c0_14 = arith.constant 0 : index
    %13 = vector.load %arg8[%c0_13, %c0_14] : memref<8x128xi32, #tpu.memory_space<vmem>>, vector<8x128xi32>
    %c4_i32 = arith.constant 4 : i32
    %14 = arith.muli %arg1, %c4_i32 : i32
    %c0_15 = arith.constant 0 : index
    %c0_16 = arith.constant 0 : index
    %15 = vector.load %arg12[%c0_15, %c0_16] : memref<8x128xf32, #tpu.memory_space<vmem>>, vector<8x128xf32>
    %c0_i32_17 = arith.constant 0 : i32
    %c8_i32 = arith.constant 8 : i32
    %16 = arith.muli %c0_i32_17, %c8_i32 : i32
    %17 = arith.index_cast %16 : i32 to index
    %c0_18 = arith.constant 0 : index
    %18 = vector.load %arg11[%17, %c0_18] : memref<32x384xf32, #tpu.memory_space<vmem>>, vector<8x384xf32>
    %cst_19 = arith.constant dense<0.000000e+00> : vector<8x384xf32>
    %19 = tpu.matmul %15, %11, %cst_19 {dimension_numbers = #tpu.dot_dimension_numbers<[1], [0], [0], [1], [0, 0, 1, 1], [], []>} : vector<8x128xf32>, vector<128x384xf32>, vector<8x384xf32> -> vector<8x384xf32>
    %20 = vector.extract_strided_slice %18 {offsets = [0, 0], sizes = [8, 128], strides = [1, 1]} : vector<8x384xf32> to vector<8x128xf32>
    %21 = vector.extract_strided_slice %19 {offsets = [0, 0], sizes = [8, 128], strides = [1, 1]} : vector<8x384xf32> to vector<8x128xf32>
    %22 = arith.addf %20, %21 : vector<8x128xf32>
    %23 = arith.negf %22 : vector<8x128xf32>
    %24 = math.exp %23 : vector<8x128xf32>
    %cst_20 = arith.constant 1.000000e+00 : f32
    %25 = vector.broadcast %cst_20 : f32 to vector<8x128xf32>
    %26 = arith.addf %25, %24 : vector<8x128xf32>
    %27 = arith.divf %25, %26 : vector<8x128xf32>
    %28 = vector.extract_strided_slice %18 {offsets = [0, 128], sizes = [8, 128], strides = [1, 1]} : vector<8x384xf32> to vector<8x128xf32>
    %29 = vector.extract_strided_slice %19 {offsets = [0, 128], sizes = [8, 128], strides = [1, 1]} : vector<8x384xf32> to vector<8x128xf32>
    %30 = arith.addf %28, %29 : vector<8x128xf32>
    %31 = arith.negf %30 : vector<8x128xf32>
    %32 = math.exp %31 : vector<8x128xf32>
    %cst_21 = arith.constant 1.000000e+00 : f32
    %33 = vector.broadcast %cst_21 : f32 to vector<8x128xf32>
    %34 = arith.addf %33, %32 : vector<8x128xf32>
    %35 = arith.divf %33, %34 : vector<8x128xf32>
    %36 = vector.extract_strided_slice %18 {offsets = [0, 256], sizes = [8, 128], strides = [1, 1]} : vector<8x384xf32> to vector<8x128xf32>
    %37 = vector.extract_strided_slice %19 {offsets = [0, 256], sizes = [8, 128], strides = [1, 1]} : vector<8x384xf32> to vector<8x128xf32>
    %38 = vector.broadcast %12 : vector<1x128xf32> to vector<8x128xf32>
    %39 = arith.addf %37, %38 : vector<8x128xf32>
    %40 = arith.mulf %27, %39 : vector<8x128xf32>
    %41 = arith.addf %36, %40 : vector<8x128xf32>
    %42 = math.tanh %41 : vector<8x128xf32>
    %cst_22 = arith.constant 1.000000e+00 : f32
    %43 = vector.broadcast %cst_22 : f32 to vector<8x128xf32>
    %44 = arith.subf %43, %35 : vector<8x128xf32>
    %45 = arith.mulf %44, %42 : vector<8x128xf32>
    %46 = arith.mulf %35, %15 : vector<8x128xf32>
    %47 = arith.addf %45, %46 : vector<8x128xf32>
    %48 = arith.addi %14, %c0_i32_17 : i32
    %49 = vector.broadcast %48 : i32 to vector<8x128xi32>
    %50 = arith.cmpi sgt, %13, %49 : vector<8x128xi32>
    %cst_23 = arith.constant 0.000000e+00 : f32
    %51 = vector.broadcast %cst_23 : f32 to vector<8x128xf32>
    %52 = arith.select %50, %47, %51 : vector<8x128xi1>, vector<8x128xf32>
    %53 = arith.index_cast %c0_i32_17 : i32 to index
    %c0_24 = arith.constant 0 : index
    %c0_25 = arith.constant 0 : index
    %54 = vector.load %arg9[%53, %c0_24, %c0_25] : memref<4x8x128xf32, #tpu.memory_space<vmem>>, vector<1x8x128xf32>
    %55 = vector.shape_cast %54 : vector<1x8x128xf32> to vector<8x128xf32>
    %56 = vector.shape_cast %52 : vector<8x128xf32> to vector<1x8x128xf32>
    tpu.vector_store %arg9[%53, %c0_24, %c0_25], %56 {strides = array<i32>} : memref<4x8x128xf32, #tpu.memory_space<vmem>>, vector<1x8x128xf32>,
    %57 = arith.select %50, %47, %15 : vector<8x128xi1>, vector<8x128xf32>
    %c1_i32 = arith.constant 1 : i32
    %c8_i32_26 = arith.constant 8 : i32
    %58 = arith.muli %c1_i32, %c8_i32_26 : i32
    %59 = arith.index_cast %58 : i32 to index
    %c0_27 = arith.constant 0 : index
    %60 = vector.load %arg11[%59, %c0_27] : memref<32x384xf32, #tpu.memory_space<vmem>>, vector<8x384xf32>
    %cst_28 = arith.constant dense<0.000000e+00> : vector<8x384xf32>
    %61 = tpu.matmul %57, %11, %cst_28 {dimension_numbers = #tpu.dot_dimension_numbers<[1], [0], [0], [1], [0, 0, 1, 1], [], []>} : vector<8x128xf32>, vector<128x384xf32>, vector<8x384xf32> -> vector<8x384xf32>
    %62 = vector.extract_strided_slice %60 {offsets = [0, 0], sizes = [8, 128], strides = [1, 1]} : vector<8x384xf32> to vector<8x128xf32>
    %63 = vector.extract_strided_slice %61 {offsets = [0, 0], sizes = [8, 128], strides = [1, 1]} : vector<8x384xf32> to vector<8x128xf32>
    %64 = arith.addf %62, %63 : vector<8x128xf32>
    %65 = arith.negf %64 : vector<8x128xf32>
    %66 = math.exp %65 : vector<8x128xf32>
    %cst_29 = arith.constant 1.000000e+00 : f32
    %67 = vector.broadcast %cst_29 : f32 to vector<8x128xf32>
    %68 = arith.addf %67, %66 : vector<8x128xf32>
    %69 = arith.divf %67, %68 : vector<8x128xf32>
    %70 = vector.extract_strided_slice %60 {offsets = [0, 128], sizes = [8, 128], strides = [1, 1]} : vector<8x384xf32> to vector<8x128xf32>
    %71 = vector.extract_strided_slice %61 {offsets = [0, 128], sizes = [8, 128], strides = [1, 1]} : vector<8x384xf32> to vector<8x128xf32>
    %72 = arith.addf %70, %71 : vector<8x128xf32>
    %73 = arith.negf %72 : vector<8x128xf32>
    %74 = math.exp %73 : vector<8x128xf32>
    %cst_30 = arith.constant 1.000000e+00 : f32
    %75 = vector.broadcast %cst_30 : f32 to vector<8x128xf32>
    %76 = arith.addf %75, %74 : vector<8x128xf32>
    %77 = arith.divf %75, %76 : vector<8x128xf32>
    %78 = vector.extract_strided_slice %60 {offsets = [0, 256], sizes = [8, 128], strides = [1, 1]} : vector<8x384xf32> to vector<8x128xf32>
    %79 = vector.extract_strided_slice %61 {offsets = [0, 256], sizes = [8, 128], strides = [1, 1]} : vector<8x384xf32> to vector<8x128xf32>
    %80 = vector.broadcast %12 : vector<1x128xf32> to vector<8x128xf32>
    %81 = arith.addf %79, %80 : vector<8x128xf32>
    %82 = arith.mulf %69, %81 : vector<8x128xf32>
    %83 = arith.addf %78, %82 : vector<8x128xf32>
    %84 = math.tanh %83 : vector<8x128xf32>
    %cst_31 = arith.constant 1.000000e+00 : f32
    %85 = vector.broadcast %cst_31 : f32 to vector<8x128xf32>
    %86 = arith.subf %85, %77 : vector<8x128xf32>
    %87 = arith.mulf %86, %84 : vector<8x128xf32>
    %88 = arith.mulf %77, %57 : vector<8x128xf32>
    %89 = arith.addf %87, %88 : vector<8x128xf32>
    %90 = arith.addi %14, %c1_i32 : i32
    %91 = vector.broadcast %90 : i32 to vector<8x128xi32>
    %92 = arith.cmpi sgt, %13, %91 : vector<8x128xi32>
    %cst_32 = arith.constant 0.000000e+00 : f32
    %93 = vector.broadcast %cst_32 : f32 to vector<8x128xf32>
    %94 = arith.select %92, %89, %93 : vector<8x128xi1>, vector<8x128xf32>
    %95 = arith.index_cast %c1_i32 : i32 to index
    %c0_33 = arith.constant 0 : index
    %c0_34 = arith.constant 0 : index
    %96 = vector.load %arg9[%95, %c0_33, %c0_34] : memref<4x8x128xf32, #tpu.memory_space<vmem>>, vector<1x8x128xf32>
    %97 = vector.shape_cast %96 : vector<1x8x128xf32> to vector<8x128xf32>
    %98 = vector.shape_cast %94 : vector<8x128xf32> to vector<1x8x128xf32>
    tpu.vector_store %arg9[%95, %c0_33, %c0_34], %98 {strides = array<i32>} : memref<4x8x128xf32, #tpu.memory_space<vmem>>, vector<1x8x128xf32>,
    %99 = arith.select %92, %89, %57 : vector<8x128xi1>, vector<8x128xf32>
    %c2_i32 = arith.constant 2 : i32
    %c8_i32_35 = arith.constant 8 : i32
    %100 = arith.muli %c2_i32, %c8_i32_35 : i32
    %101 = arith.index_cast %100 : i32 to index
    %c0_36 = arith.constant 0 : index
    %102 = vector.load %arg11[%101, %c0_36] : memref<32x384xf32, #tpu.memory_space<vmem>>, vector<8x384xf32>
    %cst_37 = arith.constant dense<0.000000e+00> : vector<8x384xf32>
    %103 = tpu.matmul %99, %11, %cst_37 {dimension_numbers = #tpu.dot_dimension_numbers<[1], [0], [0], [1], [0, 0, 1, 1], [], []>} : vector<8x128xf32>, vector<128x384xf32>, vector<8x384xf32> -> vector<8x384xf32>
    %104 = vector.extract_strided_slice %102 {offsets = [0, 0], sizes = [8, 128], strides = [1, 1]} : vector<8x384xf32> to vector<8x128xf32>
    %105 = vector.extract_strided_slice %103 {offsets = [0, 0], sizes = [8, 128], strides = [1, 1]} : vector<8x384xf32> to vector<8x128xf32>
    %106 = arith.addf %104, %105 : vector<8x128xf32>
    %107 = arith.negf %106 : vector<8x128xf32>
    %108 = math.exp %107 : vector<8x128xf32>
    %cst_38 = arith.constant 1.000000e+00 : f32
    %109 = vector.broadcast %cst_38 : f32 to vector<8x128xf32>
    %110 = arith.addf %109, %108 : vector<8x128xf32>
    %111 = arith.divf %109, %110 : vector<8x128xf32>
    %112 = vector.extract_strided_slice %102 {offsets = [0, 128], sizes = [8, 128], strides = [1, 1]} : vector<8x384xf32> to vector<8x128xf32>
    %113 = vector.extract_strided_slice %103 {offsets = [0, 128], sizes = [8, 128], strides = [1, 1]} : vector<8x384xf32> to vector<8x128xf32>
    %114 = arith.addf %112, %113 : vector<8x128xf32>
    %115 = arith.negf %114 : vector<8x128xf32>
    %116 = math.exp %115 : vector<8x128xf32>
    %cst_39 = arith.constant 1.000000e+00 : f32
    %117 = vector.broadcast %cst_39 : f32 to vector<8x128xf32>
    %118 = arith.addf %117, %116 : vector<8x128xf32>
    %119 = arith.divf %117, %118 : vector<8x128xf32>
    %120 = vector.extract_strided_slice %102 {offsets = [0, 256], sizes = [8, 128], strides = [1, 1]} : vector<8x384xf32> to vector<8x128xf32>
    %121 = vector.extract_strided_slice %103 {offsets = [0, 256], sizes = [8, 128], strides = [1, 1]} : vector<8x384xf32> to vector<8x128xf32>
    %122 = vector.broadcast %12 : vector<1x128xf32> to vector<8x128xf32>
    %123 = arith.addf %121, %122 : vector<8x128xf32>
    %124 = arith.mulf %111, %123 : vector<8x128xf32>
    %125 = arith.addf %120, %124 : vector<8x128xf32>
    %126 = math.tanh %125 : vector<8x128xf32>
    %cst_40 = arith.constant 1.000000e+00 : f32
    %127 = vector.broadcast %cst_40 : f32 to vector<8x128xf32>
    %128 = arith.subf %127, %119 : vector<8x128xf32>
    %129 = arith.mulf %128, %126 : vector<8x128xf32>
    %130 = arith.mulf %119, %99 : vector<8x128xf32>
    %131 = arith.addf %129, %130 : vector<8x128xf32>
    %132 = arith.addi %14, %c2_i32 : i32
    %133 = vector.broadcast %132 : i32 to vector<8x128xi32>
    %134 = arith.cmpi sgt, %13, %133 : vector<8x128xi32>
    %cst_41 = arith.constant 0.000000e+00 : f32
    %135 = vector.broadcast %cst_41 : f32 to vector<8x128xf32>
    %136 = arith.select %134, %131, %135 : vector<8x128xi1>, vector<8x128xf32>
    %137 = arith.index_cast %c2_i32 : i32 to index
    %c0_42 = arith.constant 0 : index
    %c0_43 = arith.constant 0 : index
    %138 = vector.load %arg9[%137, %c0_42, %c0_43] : memref<4x8x128xf32, #tpu.memory_space<vmem>>, vector<1x8x128xf32>
    %139 = vector.shape_cast %138 : vector<1x8x128xf32> to vector<8x128xf32>
    %140 = vector.shape_cast %136 : vector<8x128xf32> to vector<1x8x128xf32>
    tpu.vector_store %arg9[%137, %c0_42, %c0_43], %140 {strides = array<i32>} : memref<4x8x128xf32, #tpu.memory_space<vmem>>, vector<1x8x128xf32>,
    %141 = arith.select %134, %131, %99 : vector<8x128xi1>, vector<8x128xf32>
    %c3_i32 = arith.constant 3 : i32
    %c8_i32_44 = arith.constant 8 : i32
    %142 = arith.muli %c3_i32, %c8_i32_44 : i32
    %143 = arith.index_cast %142 : i32 to index
    %c0_45 = arith.constant 0 : index
    %144 = vector.load %arg11[%143, %c0_45] : memref<32x384xf32, #tpu.memory_space<vmem>>, vector<8x384xf32>
    %cst_46 = arith.constant dense<0.000000e+00> : vector<8x384xf32>
    %145 = tpu.matmul %141, %11, %cst_46 {dimension_numbers = #tpu.dot_dimension_numbers<[1], [0], [0], [1], [0, 0, 1, 1], [], []>} : vector<8x128xf32>, vector<128x384xf32>, vector<8x384xf32> -> vector<8x384xf32>
    %146 = vector.extract_strided_slice %144 {offsets = [0, 0], sizes = [8, 128], strides = [1, 1]} : vector<8x384xf32> to vector<8x128xf32>
    %147 = vector.extract_strided_slice %145 {offsets = [0, 0], sizes = [8, 128], strides = [1, 1]} : vector<8x384xf32> to vector<8x128xf32>
    %148 = arith.addf %146, %147 : vector<8x128xf32>
    %149 = arith.negf %148 : vector<8x128xf32>
    %150 = math.exp %149 : vector<8x128xf32>
    %cst_47 = arith.constant 1.000000e+00 : f32
    %151 = vector.broadcast %cst_47 : f32 to vector<8x128xf32>
    %152 = arith.addf %151, %150 : vector<8x128xf32>
    %153 = arith.divf %151, %152 : vector<8x128xf32>
    %154 = vector.extract_strided_slice %144 {offsets = [0, 128], sizes = [8, 128], strides = [1, 1]} : vector<8x384xf32> to vector<8x128xf32>
    %155 = vector.extract_strided_slice %145 {offsets = [0, 128], sizes = [8, 128], strides = [1, 1]} : vector<8x384xf32> to vector<8x128xf32>
    %156 = arith.addf %154, %155 : vector<8x128xf32>
    %157 = arith.negf %156 : vector<8x128xf32>
    %158 = math.exp %157 : vector<8x128xf32>
    %cst_48 = arith.constant 1.000000e+00 : f32
    %159 = vector.broadcast %cst_48 : f32 to vector<8x128xf32>
    %160 = arith.addf %159, %158 : vector<8x128xf32>
    %161 = arith.divf %159, %160 : vector<8x128xf32>
    %162 = vector.extract_strided_slice %144 {offsets = [0, 256], sizes = [8, 128], strides = [1, 1]} : vector<8x384xf32> to vector<8x128xf32>
    %163 = vector.extract_strided_slice %145 {offsets = [0, 256], sizes = [8, 128], strides = [1, 1]} : vector<8x384xf32> to vector<8x128xf32>
    %164 = vector.broadcast %12 : vector<1x128xf32> to vector<8x128xf32>
    %165 = arith.addf %163, %164 : vector<8x128xf32>
    %166 = arith.mulf %153, %165 : vector<8x128xf32>
    %167 = arith.addf %162, %166 : vector<8x128xf32>
    %168 = math.tanh %167 : vector<8x128xf32>
    %cst_49 = arith.constant 1.000000e+00 : f32
    %169 = vector.broadcast %cst_49 : f32 to vector<8x128xf32>
    %170 = arith.subf %169, %161 : vector<8x128xf32>
    %171 = arith.mulf %170, %168 : vector<8x128xf32>
    %172 = arith.mulf %161, %141 : vector<8x128xf32>
    %173 = arith.addf %171, %172 : vector<8x128xf32>
    %174 = arith.addi %14, %c3_i32 : i32
    %175 = vector.broadcast %174 : i32 to vector<8x128xi32>
    %176 = arith.cmpi sgt, %13, %175 : vector<8x128xi32>
    %cst_50 = arith.constant 0.000000e+00 : f32
    %177 = vector.broadcast %cst_50 : f32 to vector<8x128xf32>
    %178 = arith.select %176, %173, %177 : vector<8x128xi1>, vector<8x128xf32>
    %179 = arith.index_cast %c3_i32 : i32 to index
    %c0_51 = arith.constant 0 : index
    %c0_52 = arith.constant 0 : index
    %180 = vector.load %arg9[%179, %c0_51, %c0_52] : memref<4x8x128xf32, #tpu.memory_space<vmem>>, vector<1x8x128xf32>
    %181 = vector.shape_cast %180 : vector<1x8x128xf32> to vector<8x128xf32>
    %182 = vector.shape_cast %178 : vector<8x128xf32> to vector<1x8x128xf32>
    tpu.vector_store %arg9[%179, %c0_51, %c0_52], %182 {strides = array<i32>} : memref<4x8x128xf32, #tpu.memory_space<vmem>>, vector<1x8x128xf32>,
    %183 = arith.select %176, %173, %141 : vector<8x128xi1>, vector<8x128xf32>
    %c4_i32_53 = arith.constant 4 : i32
    %c0_54 = arith.constant 0 : index
    %c0_55 = arith.constant 0 : index
    %184 = vector.load %arg12[%c0_54, %c0_55] : memref<8x128xf32, #tpu.memory_space<vmem>>, vector<8x128xf32>
    tpu.vector_store %arg12[%c0_54, %c0_55], %183 {strides = array<i32>} : memref<8x128xf32, #tpu.memory_space<vmem>>, vector<8x128xf32>,
    %c1_i32_56 = arith.constant 1 : i32
    %185 = arith.cmpi eq, %arg1, %c1_i32_56 : i32
    %186 = arith.extui %185 : i1 to i32
    %c0_i32_57 = arith.constant 0 : i32
    %187 = arith.cmpi ne, %186, %c0_i32_57 : i32
    scf.if %187 {
      %c0_58 = arith.constant 0 : index
      %c0_59 = arith.constant 0 : index
      %188 = vector.load %arg10[%c0_58, %c0_59] : memref<8x128xf32, #tpu.memory_space<vmem>>, vector<8x128xf32>
      tpu.vector_store %arg10[%c0_58, %c0_59], %183 {strides = array<i32>} : memref<8x128xf32, #tpu.memory_space<vmem>>, vector<8x128xf32>,
    } else {
    }
    return
  }
  func.func @transform_0(%arg0: i32, %arg1: i32) -> (i32, i32, i32) {
    %c0_i32 = arith.constant 0 : i32
    %c0_i32_0 = arith.constant 0 : i32
    return %arg1, %arg0, %c0_i32 : i32, i32, i32
  }
  func.func @transform_1(%arg0: i32, %arg1: i32) -> (i32, i32) {
    %c0_i32 = arith.constant 0 : i32
    %c0_i32_0 = arith.constant 0 : i32
    return %arg0, %c0_i32 : i32, i32
  }
  func.func @transform_2(%arg0: i32, %arg1: i32) -> (i32, i32) {
    %c0_i32 = arith.constant 0 : i32
    %c0_i32_0 = arith.constant 0 : i32
    %c0_i32_1 = arith.constant 0 : i32
    return %c0_i32, %c0_i32_0 : i32, i32
  }
  func.func @transform_3(%arg0: i32, %arg1: i32) -> (i32, i32) {
    %c0_i32 = arith.constant 0 : i32
    %c0_i32_0 = arith.constant 0 : i32
    %c0_i32_1 = arith.constant 0 : i32
    return %c0_i32, %c0_i32_0 : i32, i32
  }
  func.func @transform_4(%arg0: i32, %arg1: i32) -> (i32, i32) {
    %c0_i32 = arith.constant 0 : i32
    %c0_i32_0 = arith.constant 0 : i32
    %c0_i32_1 = arith.constant 0 : i32
    return %c0_i32, %c0_i32_0 : i32, i32
  }
  func.func @transform_5(%arg0: i32, %arg1: i32) -> (i32, i32) {
    %c0_i32 = arith.constant 0 : i32
    %c0_i32_0 = arith.constant 0 : i32
    %c0_i32_1 = arith.constant 0 : i32
    return %c0_i32, %c0_i32_0 : i32, i32
  }
  func.func @transform_6(%arg0: i32, %arg1: i32) -> (i32, i32) {
    %c0_i32 = arith.constant 0 : i32
    %c0_i32_0 = arith.constant 0 : i32
    return %arg0, %c0_i32 : i32, i32
  }
  func.func @transform_7(%arg0: i32, %arg1: i32) -> (i32, i32, i32) {
    %c0_i32 = arith.constant 0 : i32
    %c0_i32_0 = arith.constant 0 : i32
    return %arg1, %arg0, %c0_i32 : i32, i32, i32
  }
  func.func @transform_8(%arg0: i32, %arg1: i32) -> (i32, i32) {
    %c0_i32 = arith.constant 0 : i32
    %c0_i32_0 = arith.constant 0 : i32
    return %arg0, %c0_i32 : i32, i32
  }
}

</mosaic_0001>

<bundles_post_ra>
// kernel: neg.1
= control target key start
LH: loop header
LB: loop body
LE: loop exit
PB: predicated region body
PF: predicated region fallthrough
CT: control target
= control target key end

     0   :  { %s24_s0 = inlined_call_operand.vmem [shape: s32[4], index: 0, kind: input, shape index: {}]   ;;  %s25_s1 = inlined_call_operand.vmem [shape: s32[4], index: 1, kind: output, shape index: {}]  }
   0x1   :  { %v2_v0 = vld [vmem:[%s24_s0] sm:$0x1] }
   0x2   :  { %v5_v1 = vsub.s32 0, %v2_v0 }
   0x4   :  { %7 = vst [vmem:[%s25_s1] sm:$0x1] %v5_v1 }

</bundles_post_ra>
